<compile_context>
chip_gen: v7x
topology: tpu7x:2x2x1
jax: 0.10.0
libtpu: 0.0.40
codegen_flags: <defaults>
</compile_context>

<pallas_src>
import functools

import jax
import jax.numpy as jnp
from jax.experimental import pallas as pl
from jax.experimental.pallas import tpu as pltpu


# ----------------------------------------------------------------------------
# Fused kernel (single grid step):
#   y   = LHS @ R                     (conv as one lane-dense MXU matmul, f32)
#   BN  = per-channel batch stats over (N, Ho, Wo), two-pass variance
#   out = LeakyReLU(gamma * (y - mean) / sqrt(var + eps) + beta)
# Per-channel stats are extracted from the (w, c)-interleaved lanes with
# static 0/1 gather (G) / scatter (GT) matmuls (stays on the MXU, avoids a
# lane-crossing reshape).
# ----------------------------------------------------------------------------
def _fused_conv_bn_act_kernel(lhs_ref, r_ref, gamma_ref, beta_ref, g_ref,
                              gt_ref, o_ref, *, eps, use_act, negative_slope,
                              count):
    # lhs_ref:   (M, K)  = (N*Ho, KH*Wp*Cin)   im2row'd input (bf16 or f32)
    # r_ref:     (K, WC) = (KH*Wp*Cin, Wo*Cout) banded weight (bf16 or f32)
    # gamma_ref: (1, Cout) f32     BN scale
    # beta_ref:  (1, Cout) f32     BN shift
    # g_ref:     (WC, Cout) f32    0/1 channel-gather matrix
    # gt_ref:    (Cout, WC) f32    0/1 channel-scatter matrix
    # o_ref:     (M, WC) f32       final output (stored once)
    inv_cnt = 1.0 / count

    # ---- convolution: one MXU matmul, f32 accumulation ----
    y = jnp.dot(lhs_ref[...], r_ref[...],
                preferred_element_type=jnp.float32)              # (M, WC)

    # ---- BatchNorm batch statistics (two-pass / shifted variance) ----
    s_row = jnp.sum(y, axis=0, keepdims=True)                    # (1, WC)
    mean_c = jnp.dot(s_row, g_ref[...],
                     preferred_element_type=jnp.float32) * inv_cnt    # (1, Cout)
    mean_row = jnp.dot(mean_c, gt_ref[...],
                       preferred_element_type=jnp.float32)            # (1, WC)

    d = y - mean_row                                             # centered
    q_row = jnp.sum(d * d, axis=0, keepdims=True)                # (1, WC)
    var_c = jnp.dot(q_row, g_ref[...],
                    preferred_element_type=jnp.float32) * inv_cnt     # (1, Cout)

    inv_c = jax.lax.rsqrt(var_c + eps)
    scale_c = gamma_ref[...] * inv_c                             # (1, Cout)
    scale_row = jnp.dot(scale_c, gt_ref[...],
                        preferred_element_type=jnp.float32)           # (1, WC)
    shift_row = jnp.dot(beta_ref[...], gt_ref[...],
                        preferred_element_type=jnp.float32)           # (1, WC)

    out = d * scale_row + shift_row
    if use_act:
        out = jnp.maximum(out, negative_slope * out)             # LeakyReLU
    o_ref[...] = out.astype(o_ref.dtype)                         # single store


# ----------------------------------------------------------------------------
# Wrapper: ConvBlock forward (PyTorch-convention NCHW input / HWIO weight).
# ----------------------------------------------------------------------------
def conv_block_forward(x_nchw, w_hwio, bias, gamma, beta, *,
                       stride=1, pad=1, use_act=True, eps=1e-5,
                       negative_slope=0.2, compute_dtype=jnp.bfloat16):
    # NOTE: `bias` is intentionally NOT used: with train-mode BatchNorm the
    # per-channel conv bias cancels exactly in the forward output.
    del bias
    x_nchw = x_nchw.astype(jnp.float32)
    N, Cin, H, W = x_nchw.shape
    KH, KW, _, Cout = w_hwio.shape

    # NCHW -> NHWC, zero-pad spatial dims, merge (W, Cin) into a lane row.
    x = jnp.transpose(x_nchw, (0, 2, 3, 1))
    xp = jnp.pad(x, ((0, 0), (pad, pad), (pad, pad), (0, 0)))
    Hp, Wp = H + 2 * pad, W + 2 * pad
    Ho = (Hp - KH) // stride + 1
    Wo = (Wp - KW) // stride + 1
    WC = Wo * Cout
    M = N * Ho
    K = KH * Wp * Cin

    # im2row over H only (layout plumbing, done once by XLA):
    #   LHS[n*Ho + h, kh*Wp*Cin + :] = xp[n, h*stride + kh, :, :]
    x2 = xp.reshape(N, Hp, Wp * Cin)                             # (N, Hp, Wp*Cin)
    h_idx = jnp.arange(Ho)[:, None] * stride + jnp.arange(KH)[None, :]  # (Ho, KH)
    lhs = x2[:, h_idx, :]                                        # (N, Ho, KH, Wp*Cin)
    lhs = lhs.reshape(M, K).astype(compute_dtype)

    # Banded (Toeplitz-expanded) weight with KH folded into the contraction:
    #   R[kh*Wp*Cin + wp*Cin + ci, w*Cout + c] = W[kh, wp - w*stride, ci, c]
    # when 0 <= wp - w*stride < KW, else 0.
    wgt = w_hwio.astype(jnp.float32)
    wp_i = jnp.arange(Wp)
    w_i = jnp.arange(Wo)
    kw_i = jnp.arange(KW)
    sel = (wp_i[None, :, None] ==
           (w_i[None, None, :] * stride + kw_i[:, None, None])
           ).astype(jnp.float32)                                 # (KW, Wp, Wo)
    R = jnp.einsum('kpw,akic->apiwc', sel, wgt)                  # (KH,Wp,Cin,Wo,Cout)
    R = R.reshape(K, WC).astype(compute_dtype)

    gamma2 = gamma.astype(jnp.float32).reshape(1, Cout)
    beta2 = beta.astype(jnp.float32).reshape(1, Cout)

    # Static 0/1 channel gather / scatter matrices (constant-folded by XLA).
    lane = jnp.arange(WC)
    ch = jnp.arange(Cout)
    G = (lane[:, None] % Cout == ch[None, :]).astype(jnp.float32)   # (WC, Cout)
    GT = G.T                                                        # (Cout, WC)

    out2 = pl.pallas_call(
        functools.partial(_fused_conv_bn_act_kernel, eps=eps, use_act=use_act,
                          negative_slope=negative_slope,
                          count=float(N * Ho * Wo)),
        out_shape=jax.ShapeDtypeStruct((M, WC), jnp.float32),
        grid=(1,),
        in_specs=[
            pl.BlockSpec((M, K), lambda i: (0, 0)),
            pl.BlockSpec((K, WC), lambda i: (0, 0)),
            pl.BlockSpec((1, Cout), lambda i: (0, 0)),
            pl.BlockSpec((1, Cout), lambda i: (0, 0)),
            pl.BlockSpec((WC, Cout), lambda i: (0, 0)),
            pl.BlockSpec((Cout, WC), lambda i: (0, 0)),
        ],
        out_specs=pl.BlockSpec((M, WC), lambda i: (0, 0)),
        compiler_params=pltpu.CompilerParams(
            dimension_semantics=("arbitrary",)),
    )(lhs, R, gamma2, beta2, G, GT)

    # (N*Ho, Wo*Cout) -> (N, Ho, Wo, Cout) -> NCHW (PyTorch convention).
    out_nhwc = out2.reshape(N, Ho, Wo, Cout)
    return jnp.transpose(out_nhwc, (0, 3, 1, 2))


# ----------------------------------------------------------------------------
# Pure-JAX reference (correctness sanity check; includes the conv bias).
# ----------------------------------------------------------------------------
def conv_block_reference(x_nchw, w_hwio, bias, gamma, beta, *,
                         stride=1, pad=1, use_act=True, eps=1e-5,
                         negative_slope=0.2):
    y = jax.lax.conv_general_dilated(
        x_nchw.astype(jnp.float32),
        jnp.transpose(w_hwio, (3, 2, 0, 1)).astype(jnp.float32),  # OIHW
        window_strides=(stride, stride),
        padding=((pad, pad), (pad, pad)),
        dimension_numbers=("NCHW", "OIHW", "NCHW"),
    ) + bias.reshape(1, -1, 1, 1)
    mean = jnp.mean(y, axis=(0, 2, 3), keepdims=True)
    var = jnp.mean((y - mean) ** 2, axis=(0, 2, 3), keepdims=True)
    out = (y - mean) * jax.lax.rsqrt(var + eps)
    out = out * gamma.reshape(1, -1, 1, 1) + beta.reshape(1, -1, 1, 1)
    if use_act:
        out = jnp.where(out >= 0, out, negative_slope * out)
    return out


if __name__ == "__main__":
    # ConvBlock(ni=4, no=8, ks=3, stride=1, pad=1, use_act=True)
    ni, no, ks, stride, pad = 4, 8, 3, 1, 1
    N, H, W = 2, 16, 16

    key = jax.random.PRNGKey(0)
    kx, kw, kb = jax.random.split(key, 3)

    x = jax.random.normal(kx, (N, ni, H, W), dtype=jnp.float32)        # NCHW
    w_hwio = 0.1 * jax.random.normal(kw, (ks, ks, ni, no), jnp.float32)
    bias = 0.1 * jax.random.normal(kb, (no,), jnp.float32)
    gamma = jnp.ones((no,), jnp.float32)   # nn.BatchNorm2d default init
    beta = jnp.zeros((no,), jnp.float32)

    ref = conv_block_reference(x, w_hwio, bias, gamma, beta,
                               stride=stride, pad=pad, use_act=True)

    # f32 compute path: tight tolerance (also proves the bias cancellation).
    fwd_f32 = jax.jit(functools.partial(conv_block_forward, stride=stride,
                                        pad=pad, use_act=True,
                                        compute_dtype=jnp.float32))
    out_f32 = jax.block_until_ready(fwd_f32(x, w_hwio, bias, gamma, beta))
    assert out_f32.shape == (N, no, H, W), out_f32.shape
    assert jnp.allclose(out_f32, ref, rtol=1e-4, atol=1e-4), float(
        jnp.max(jnp.abs(out_f32 - ref)))

    # bf16 MXU path (default): looser tolerance for bf16 matmul inputs.
    fwd_bf16 = jax.jit(functools.partial(conv_block_forward, stride=stride,
                                         pad=pad, use_act=True,
                                         compute_dtype=jnp.bfloat16))
    out_bf16 = jax.block_until_ready(fwd_bf16(x, w_hwio, bias, gamma, beta))
    assert out_bf16.shape == (N, no, H, W), out_bf16.shape
    assert jnp.allclose(out_bf16, ref, rtol=3e-2, atol=3e-2), float(
        jnp.max(jnp.abs(out_bf16 - ref)))

    print("KERNEL_OK")
</pallas_src>

<mosaic_0001>
module attributes {stable_mosaic.version = 11 : i64} {
  func.func @_fused_conv_bn_act_kernel(%arg0: i32, %arg1: memref<32x216xf32, #tpu.memory_space<vmem>>, %arg2: memref<216x128xf32, #tpu.memory_space<vmem>>, %arg3: memref<1x8xf32, #tpu.memory_space<vmem>>, %arg4: memref<1x8xf32, #tpu.memory_space<vmem>>, %arg5: memref<128x8xf32, #tpu.memory_space<vmem>>, %arg6: memref<8x128xf32, #tpu.memory_space<vmem>>, %arg7: memref<32x128xf32, #tpu.memory_space<vmem>>) attributes {dimension_semantics = [#tpu.dimension_semantics<arbitrary>], iteration_bounds = array<i64: 1>, scalar_prefetch = 0 : i64, scratch_operands = 0 : i64, tpu.core_type = #tpu.core_type<tc>, window_params = [{pipeline_mode = #tpu.pipeline_mode<synchronous>, transform_indices = @transform_0, window_bounds = array<i64: 32, 216>}, {pipeline_mode = #tpu.pipeline_mode<synchronous>, transform_indices = @transform_1, window_bounds = array<i64: 216, 128>}, {pipeline_mode = #tpu.pipeline_mode<synchronous>, transform_indices = @transform_2, window_bounds = array<i64: 1, 8>}, {pipeline_mode = #tpu.pipeline_mode<synchronous>, transform_indices = @transform_3, window_bounds = array<i64: 1, 8>}, {pipeline_mode = #tpu.pipeline_mode<synchronous>, transform_indices = @transform_4, window_bounds = array<i64: 128, 8>}, {pipeline_mode = #tpu.pipeline_mode<synchronous>, transform_indices = @transform_5, window_bounds = array<i64: 8, 128>}, {pipeline_mode = #tpu.pipeline_mode<synchronous>, transform_indices = @transform_6, window_bounds = array<i64: 32, 128>}]} {
    %c0 = arith.constant 0 : index
    %c0_0 = arith.constant 0 : index
    %0 = vector.load %arg1[%c0, %c0_0] : memref<32x216xf32, #tpu.memory_space<vmem>>, vector<32x216xf32>
    %c0_1 = arith.constant 0 : index
    %c0_2 = arith.constant 0 : index
    %1 = vector.load %arg2[%c0_1, %c0_2] : memref<216x128xf32, #tpu.memory_space<vmem>>, vector<216x128xf32>
    %cst = arith.constant dense<0.000000e+00> : vector<32x128xf32>
    %2 = tpu.matmul %0, %1, %cst {dimension_numbers = #tpu.dot_dimension_numbers<[1], [0], [0], [1], [0, 0, 1, 1], [], []>} : vector<32x216xf32>, vector<216x128xf32>, vector<32x128xf32> -> vector<32x128xf32>
    %cst_3 = arith.constant dense<0.000000e+00> : vector<128xf32>
    %3 = vector.multi_reduction <add>, %2, %cst_3 [0] : vector<32x128xf32> to vector<128xf32>
    %4 = vector.shape_cast %3 : vector<128xf32> to vector<1x128xf32>
    %c0_4 = arith.constant 0 : index
    %c0_5 = arith.constant 0 : index
    %5 = vector.load %arg5[%c0_4, %c0_5] : memref<128x8xf32, #tpu.memory_space<vmem>>, vector<128x8xf32>
    %cst_6 = arith.constant dense<0.000000e+00> : vector<1x8xf32>
    %6 = tpu.matmul %4, %5, %cst_6 {dimension_numbers = #tpu.dot_dimension_numbers<[1], [0], [0], [1], [0, 0, 1, 1], [], []>} : vector<1x128xf32>, vector<128x8xf32>, vector<1x8xf32> -> vector<1x8xf32>
    %cst_7 = arith.constant 0.001953125 : f32
    %7 = vector.broadcast %cst_7 : f32 to vector<1x8xf32>
    %8 = arith.mulf %6, %7 : vector<1x8xf32>
    %c0_8 = arith.constant 0 : index
    %c0_9 = arith.constant 0 : index
    %9 = vector.load %arg6[%c0_8, %c0_9] : memref<8x128xf32, #tpu.memory_space<vmem>>, vector<8x128xf32>
    %cst_10 = arith.constant dense<0.000000e+00> : vector<1x128xf32>
    %10 = tpu.matmul %8, %9, %cst_10 {dimension_numbers = #tpu.dot_dimension_numbers<[1], [0], [0], [1], [0, 0, 1, 1], [], []>} : vector<1x8xf32>, vector<8x128xf32>, vector<1x128xf32> -> vector<1x128xf32>
    %11 = vector.broadcast %10 : vector<1x128xf32> to vector<32x128xf32>
    %12 = arith.subf %2, %11 : vector<32x128xf32>
    %13 = arith.mulf %12, %12 : vector<32x128xf32>
    %cst_11 = arith.constant dense<0.000000e+00> : vector<128xf32>
    %14 = vector.multi_reduction <add>, %13, %cst_11 [0] : vector<32x128xf32> to vector<128xf32>
    %15 = vector.shape_cast %14 : vector<128xf32> to vector<1x128xf32>
    %c0_12 = arith.constant 0 : index
    %c0_13 = arith.constant 0 : index
    %16 = vector.load %arg5[%c0_12, %c0_13] : memref<128x8xf32, #tpu.memory_space<vmem>>, vector<128x8xf32>
    %cst_14 = arith.constant dense<0.000000e+00> : vector<1x8xf32>
    %17 = tpu.matmul %15, %16, %cst_14 {dimension_numbers = #tpu.dot_dimension_numbers<[1], [0], [0], [1], [0, 0, 1, 1], [], []>} : vector<1x128xf32>, vector<128x8xf32>, vector<1x8xf32> -> vector<1x8xf32>
    %cst_15 = arith.constant 0.001953125 : f32
    %18 = vector.broadcast %cst_15 : f32 to vector<1x8xf32>
    %19 = arith.mulf %17, %18 : vector<1x8xf32>
    %cst_16 = arith.constant 9.99999974E-6 : f32
    %20 = vector.broadcast %cst_16 : f32 to vector<1x8xf32>
    %21 = arith.addf %19, %20 : vector<1x8xf32>
    %22 = math.rsqrt %21 : vector<1x8xf32>
    %c0_17 = arith.constant 0 : index
    %c0_18 = arith.constant 0 : index
    %23 = vector.load %arg3[%c0_17, %c0_18] : memref<1x8xf32, #tpu.memory_space<vmem>>, vector<1x8xf32>
    %24 = arith.mulf %23, %22 : vector<1x8xf32>
    %c0_19 = arith.constant 0 : index
    %c0_20 = arith.constant 0 : index
    %25 = vector.load %arg6[%c0_19, %c0_20] : memref<8x128xf32, #tpu.memory_space<vmem>>, vector<8x128xf32>
    %cst_21 = arith.constant dense<0.000000e+00> : vector<1x128xf32>
    %26 = tpu.matmul %24, %25, %cst_21 {dimension_numbers = #tpu.dot_dimension_numbers<[1], [0], [0], [1], [0, 0, 1, 1], [], []>} : vector<1x8xf32>, vector<8x128xf32>, vector<1x128xf32> -> vector<1x128xf32>
    %c0_22 = arith.constant 0 : index
    %c0_23 = arith.constant 0 : index
    %27 = vector.load %arg4[%c0_22, %c0_23] : memref<1x8xf32, #tpu.memory_space<vmem>>, vector<1x8xf32>
    %c0_24 = arith.constant 0 : index
    %c0_25 = arith.constant 0 : index
    %28 = vector.load %arg6[%c0_24, %c0_25] : memref<8x128xf32, #tpu.memory_space<vmem>>, vector<8x128xf32>
    %cst_26 = arith.constant dense<0.000000e+00> : vector<1x128xf32>
    %29 = tpu.matmul %27, %28, %cst_26 {dimension_numbers = #tpu.dot_dimension_numbers<[1], [0], [0], [1], [0, 0, 1, 1], [], []>} : vector<1x8xf32>, vector<8x128xf32>, vector<1x128xf32> -> vector<1x128xf32>
    %30 = vector.broadcast %26 : vector<1x128xf32> to vector<32x128xf32>
    %31 = arith.mulf %12, %30 : vector<32x128xf32>
    %32 = vector.broadcast %29 : vector<1x128xf32> to vector<32x128xf32>
    %33 = arith.addf %31, %32 : vector<32x128xf32>
    %cst_27 = arith.constant 2.000000e-01 : f32
    %34 = vector.broadcast %cst_27 : f32 to vector<32x128xf32>
    %35 = arith.mulf %34, %33 : vector<32x128xf32>
    %36 = arith.maximumf %33, %35 : vector<32x128xf32>
    %c0_28 = arith.constant 0 : index
    %c0_29 = arith.constant 0 : index
    %37 = vector.load %arg7[%c0_28, %c0_29] : memref<32x128xf32, #tpu.memory_space<vmem>>, vector<32x128xf32>
    tpu.vector_store %arg7[%c0_28, %c0_29], %36 {strides = array<i32>} : memref<32x128xf32, #tpu.memory_space<vmem>>, vector<32x128xf32>,
    return
  }
  func.func @transform_0(%arg0: i32) -> (i32, i32) {
    %c0_i32 = arith.constant 0 : i32
    %c0_i32_0 = arith.constant 0 : i32
    %c0_i32_1 = arith.constant 0 : i32
    return %c0_i32, %c0_i32_0 : i32, i32
  }
  func.func @transform_1(%arg0: i32) -> (i32, i32) {
    %c0_i32 = arith.constant 0 : i32
    %c0_i32_0 = arith.constant 0 : i32
    %c0_i32_1 = arith.constant 0 : i32
    return %c0_i32, %c0_i32_0 : i32, i32
  }
  func.func @transform_2(%arg0: i32) -> (i32, i32) {
    %c0_i32 = arith.constant 0 : i32
    %c0_i32_0 = arith.constant 0 : i32
    %c0_i32_1 = arith.constant 0 : i32
    return %c0_i32, %c0_i32_0 : i32, i32
  }
  func.func @transform_3(%arg0: i32) -> (i32, i32) {
    %c0_i32 = arith.constant 0 : i32
    %c0_i32_0 = arith.constant 0 : i32
    %c0_i32_1 = arith.constant 0 : i32
    return %c0_i32, %c0_i32_0 : i32, i32
  }
  func.func @transform_4(%arg0: i32) -> (i32, i32) {
    %c0_i32 = arith.constant 0 : i32
    %c0_i32_0 = arith.constant 0 : i32
    %c0_i32_1 = arith.constant 0 : i32
    return %c0_i32, %c0_i32_0 : i32, i32
  }
  func.func @transform_5(%arg0: i32) -> (i32, i32) {
    %c0_i32 = arith.constant 0 : i32
    %c0_i32_0 = arith.constant 0 : i32
    %c0_i32_1 = arith.constant 0 : i32
    return %c0_i32, %c0_i32_0 : i32, i32
  }
  func.func @transform_6(%arg0: i32) -> (i32, i32) {
    %c0_i32 = arith.constant 0 : i32
    %c0_i32_0 = arith.constant 0 : i32
    %c0_i32_1 = arith.constant 0 : i32
    return %c0_i32, %c0_i32_0 : i32, i32
  }
}

</mosaic_0001>

<bundles_post_ra>
// kernel: conv_block_forward.1
= control target key start
LH: loop header
LB: loop body
LE: loop exit
PB: predicated region body
PF: predicated region fallthrough
CT: control target
= control target key end

     0   :  { %v826_v0 = vmov 0.0|0.0   ;;  %vm58_vm0 = vcmask 719872   ;;  %v827_v44 = vmov 0.0   ;;  %vm828_vm1 = vmmov 0   ;;  %s1105_s1 = inlined_call_operand.vmem [shape: f32[216,128], index: 1, kind: input, shape index: {}]   ;;  %s1106_s0 = inlined_call_operand.vmem [shape: f32[32,216], index: 0, kind: input, shape index: {}]   ;;  %s1107_s4 = inlined_call_operand.vmem [shape: f32[128,8], index: 4, kind: input, shape index: {}]   ;;  %s1108_s5 = inlined_call_operand.vmem [shape: f32[8,128], index: 5, kind: input, shape index: {}]   ;;  %s1109_s3 = inlined_call_operand.vmem [shape: f32[1,8], index: 3, kind: input, shape index: {}]   ;;  %s1110_s2 = inlined_call_operand.vmem [shape: f32[1,8], index: 2, kind: input, shape index: {}]   ;;  %s1111_s6 = inlined_call_operand.vmem [shape: f32[32,128], index: 6, kind: output, shape index: {}]  }
   0x1   :  { %734 = vmatprep.subr.bf16.mxu0 %v826_v0  ;;  %v31_v1 = vld [vmem:[%s1105_s1] sm:$0xff]  ;;  %v32_v2 = vld [vmem:[%s1105_s1 + $0x8] sm:$0xff]  ;;  %v33_v3 = vld [vmem:[%s1105_s1 + $0x10] sm:$0xff]  ;;  %773 = vmatprep.subr.bf16.mxu1 %v826_v0  ;;  %vm253_vm2 = vcmask 64512  }
   0x2   :  { %v735_v4 = vpack.c.bf16 %v32_v2, %v31_v1  ;;  %v34_v5 = vld [vmem:[%s1105_s1 + $0x18] sm:$0xff]  ;;  %v35_v7 = vld [vmem:[%s1105_s1 + $0x20] sm:$0xff]  ;;  %v36_v8 = vld [vmem:[%s1105_s1 + $0x28] sm:$0xff]  ;;  %681 = vmatprep.mubr.msk.f32.mxu1 %vm828_vm1, %v827_v44 }
   0x3   :  { %v738_v6 = vpack.c.bf16 %v34_v5, %v33_v3  ;;  %v741_v9 = vpack.c.bf16 %v36_v8, %v35_v7  ;;  %v37_v10 = vld [vmem:[%s1105_s1 + $0x30] sm:$0xff]  ;;  %v38_v11 = vld [vmem:[%s1105_s1 + $0x38] sm:$0xff]  ;;  %v24_v12 = vld [vmem:[%s1106_s0 + $0x8] sm:$0xff] }
   0x4   :  { %736 = vmatpush1.bf16.msra.mxu0 %v735_v4  ;;  %602 = vmatprep.mubr.msk.f32.mxu0 %vm58_vm0, %v24_v12  ;;  %v744_v13 = vpack.c.bf16 %v38_v11, %v37_v10  ;;  %v165_v14 = vld [vmem:[%s1107_s4] sm:$0xff]  ;;  %v40_v16 = vld [vmem:[%s1105_s1 + $0x48] sm:$0xff]  ;;  %v41_v20 = vld [vmem:[%s1105_s1 + $0x50] sm:$0xff] }
   0x5   :  { %737 = vmatprep.subr.bf16.mxu0 %v826_v0  ;;  %v39_v15 = vld [vmem:[%s1105_s1 + $0x40] sm:$0xff]  ;;  %v166_v17 = vld [vmem:[%s1107_s4 + $0x8] sm:$0xff]  ;;  %v42_v21 = vld [vmem:[%s1105_s1 + $0x58] sm:$0xff] }
   0x6   :  { %v909_v18 = vpack.c.bf16 %v166_v17, %v165_v14  ;;  %v747_v19 = vpack.c.bf16 %v40_v16, %v39_v15  ;;  %v750_v22 = vpack.c.bf16 %v42_v21, %v41_v20  ;;  %v43_v23 = vld [vmem:[%s1105_s1 + $0x60] sm:$0xff]  ;;  %v44_v24 = vld [vmem:[%s1105_s1 + $0x68] sm:$0xff]  ;;  %v45_v26 = vld [vmem:[%s1105_s1 + $0x70] sm:$0xff] }
   0x7   :  { %v753_v25 = vpack.c.bf16 %v44_v24, %v43_v23  ;;  %v46_v27 = vld [vmem:[%s1105_s1 + $0x78] sm:$0xff]  ;;  %v47_v29 = vld [vmem:[%s1105_s1 + $0x80] sm:$0xff]  ;;  %v48_v30 = vld [vmem:[%s1105_s1 + $0x88] sm:$0xff] }
   0x8   :  { %739 = vmatpush1.bf16.msra.mxu0 %v738_v6  ;;  %775 = vmatpush3.bf16.msra.mxu1 %v909_v18  ;;  %v756_v28 = vpack.c.bf16 %v46_v27, %v45_v26  ;;  %v759_v31 = vpack.c.bf16 %v48_v30, %v47_v29  ;;  %v49_v32 = vld [vmem:[%s1105_s1 + $0x90] sm:$0xff]  ;;  %v50_v33 = vld [vmem:[%s1105_s1 + $0x98] sm:$0xff]  ;;  %v51_v35 = vld [vmem:[%s1105_s1 + $0xa0] sm:$0xff] }
   0x9   :  { %740 = vmatprep.subr.bf16.mxu0 %v826_v0  ;;  %776 = vmatprep.subr.bf16.mxu1 %v826_v0  ;;  %v762_v34 = vpack.c.bf16 %v50_v33, %v49_v32  ;;  %v52_v36 = vld [vmem:[%s1105_s1 + $0xa8] sm:$0xff]  ;;  %v53_v38 = vld [vmem:[%s1105_s1 + $0xb0] sm:$0xff]  ;;  %v54_v39 = vld [vmem:[%s1105_s1 + $0xb8] sm:$0xff] }
   0xa   :  { %v765_v37 = vpack.c.bf16 %v52_v36, %v51_v35  ;;  %v768_v40 = vpack.c.bf16 %v54_v39, %v53_v38  ;;  %v55_v41 = vld [vmem:[%s1105_s1 + $0xc0] sm:$0xff]  ;;  %v56_v42 = vld [vmem:[%s1105_s1 + $0xc8] sm:$0xff]  ;;  %v57_v45 = vld [vmem:[%s1105_s1 + $0xd0] sm:$0xff] }
   0xb   :  { %v771_v43 = vpack.c.bf16 %v56_v42, %v55_v41  ;;  %v23_v46 = vld [vmem:[%s1106_s0] sm:$0xff]  ;;  %v26_v47 = vld [vmem:[%s1106_s0 + $0x18] sm:$0xff]  ;;  %v25_v48 = vld [vmem:[%s1106_s0 + $0x10] sm:$0xff] }
   0xc   :  { %742 = vmatpush1.bf16.msra.mxu0 %v741_v9  ;;  %v28_v49 = vld [vmem:[%s1106_s0 + $0x28] sm:$0xff]  ;;  %v27_v50 = vld [vmem:[%s1106_s0 + $0x20] sm:$0xff]  ;;  %v30_v51 = vld [vmem:[%s1106_s0 + $0x38] sm:$0xff] }
   0xd   :  { %743 = vmatprep.subr.bf16.mxu0 %v826_v0  ;;  %v29_v52 = vld [vmem:[%s1106_s0 + $0x30] sm:$0xff]  ;;  %v168_v54 = vld [vmem:[%s1107_s4 + $0x18] sm:$0xff]  ;;  %v169_v56 = vld [vmem:[%s1107_s4 + $0x20] sm:$0xff] }
   0xe   :  { %v167_v53 = vld [vmem:[%s1107_s4 + $0x10] sm:$0xff]  ;;  %v170_v57 = vld [vmem:[%s1107_s4 + $0x28] sm:$0xff]  ;;  %v172_v60 = vld [vmem:[%s1107_s4 + $0x38] sm:$0xff] }
   0xf   :  { %v1005_v55 = vpack.c.bf16 %v168_v54, %v167_v53  ;;  %v1015_v58 = vpack.c.bf16 %v170_v57, %v169_v56  ;;  %v171_v59 = vld [vmem:[%s1107_s4 + $0x30] sm:$0xff]  ;;  %v173_v62 = vld [vmem:[%s1107_s4 + $0x40] sm:$0xff]  ;;  %v174_v63 = vld [vmem:[%s1107_s4 + $0x48] sm:$0xff] }
  0x10   :  { %745 = vmatpush1.bf16.msra.mxu0 %v744_v13  ;;  %v783_v61 = vpack.c.bf16 %v172_v60, %v171_v59  ;;  %v786_v1 = vpack.c.bf16 %v174_v63, %v173_v62  ;;  %v175_v2 = vld [vmem:[%s1107_s4 + $0x50] sm:$0xff]  ;;  %v176_v3 = vld [vmem:[%s1107_s4 + $0x58] sm:$0xff]  ;;  %v177_v5 = vld [vmem:[%s1107_s4 + $0x60] sm:$0xff] }
  0x11   :  { %746 = vmatprep.subr.bf16.mxu0 %v826_v0  ;;  %778 = vmatpush3.bf16.msra.mxu1 %v1005_v55  ;;  %v789_v4 = vpack.c.bf16 %v176_v3, %v175_v2  ;;  %v178_v6 = vld [vmem:[%s1107_s4 + $0x68] sm:$0xff]  ;;  %v179_v8 = vld [vmem:[%s1107_s4 + $0x70] sm:$0xff]  ;;  %v180_v9 = vld [vmem:[%s1107_s4 + $0x78] sm:$0xff] }
  0x12   :  { %779 = vmatprep.subr.bf16.mxu1 %v826_v0  ;;  %v792_v7 = vpack.c.bf16 %v178_v6, %v177_v5  ;;  %v795_v10 = vpack.c.bf16 %v180_v9, %v179_v8  ;;  %v1061_v11 = vld [vmem:[%s1108_s5] sm:$0xff] }
  0x13   :  { %v421_v60 = vld [vmem:[%s1110_s2] sm:$0x1] }
  0x14   :  { %748 = vmatpush1.bf16.msra.mxu0 %v747_v19 }
  0x15   :  { %749 = vmatprep.subr.bf16.mxu0 %v826_v0  ;;  %781 = vmatpush3.bf16.msra.mxu1 %v1015_v58 }
  0x16   :  { %782 = vmatprep.subr.bf16.mxu1 %v826_v0 }
  0x18   :  { %751 = vmatpush1.bf16.msra.mxu0 %v750_v22 }
  0x19   :  { %752 = vmatprep.subr.bf16.mxu0 %v826_v0  ;;  %784 = vmatpush3.bf16.msra.mxu1 %v783_v61 }
  0x1a   :  { %785 = vmatprep.subr.bf16.mxu1 %v826_v0 }
  0x1c   :  { %754 = vmatpush1.bf16.msra.mxu0 %v753_v25 }
  0x1d   :  { %755 = vmatprep.subr.bf16.mxu0 %v826_v0  ;;  %787 = vmatpush3.bf16.msra.mxu1 %v786_v1 }
  0x1e   :  { %788 = vmatprep.subr.bf16.mxu1 %v826_v0 }
  0x20   :  { %757 = vmatpush1.bf16.msra.mxu0 %v756_v28 }
  0x21   :  { %758 = vmatprep.subr.bf16.mxu0 %v826_v0  ;;  %790 = vmatpush3.bf16.msra.mxu1 %v789_v4 }
  0x22   :  { %791 = vmatprep.subr.bf16.mxu1 %v826_v0 }
  0x24   :  { %760 = vmatpush1.bf16.msra.mxu0 %v759_v31 }
  0x25   :  { %761 = vmatprep.subr.bf16.mxu0 %v826_v0  ;;  %793 = vmatpush3.bf16.msra.mxu1 %v792_v7 }
  0x26   :  { %794 = vmatprep.subr.bf16.mxu1 %v826_v0 }
  0x28   :  { %763 = vmatpush1.bf16.msra.mxu0 %v762_v34 }
  0x29   :  { %764 = vmatprep.subr.bf16.mxu0 %v826_v0  ;;  %796 = vmatpush3.bf16.msra.mxu1 %v795_v10 }
  0x2a   :  { %684 = vmatprep.subr.mxu1 %v827_v44 }
  0x2c   :  { %766 = vmatpush1.bf16.msra.mxu0 %v765_v37 }
  0x2d   :  { %767 = vmatprep.subr.bf16.mxu0 %v826_v0 }
  0x30   :  { %769 = vmatpush1.bf16.msra.mxu0 %v768_v40 }
  0x31   :  { %770 = vmatprep.subr.bf16.mxu0 %v826_v0 }
  0x34   :  { %772 = vmatpush1.bf16.msra.mxu0 %v771_v43 }
  0x35   :  { %123 = vmatprep.subr.mxu0 %v827_v44 }
  0x38   :  { %124 = vmatpush1.msra.mxu0 %v57_v45 }
  0x39   :  { %136 = vmatmul.mubr.f32.vlgmr.msra.gmra.mrb[0].mxu0 %v23_v46  ;;  %724 = vmatprep.subr.mxu0 %v827_v44 }
  0x3a   :  { %603 = vmatprep.mubr.msk.f32.mxu0 %vm58_vm0, %v26_v47  ;;  %725 = vmatpush3.msra.mxu0 %v1061_v11 }
  0x3d   :  { %141 = vmatmul.mubr.f32.gmra.mrb[2].mxu0 %v25_v48 }
  0x3e   :  { %604 = vmatprep.mubr.msk.f32.mxu0 %vm58_vm0, %v28_v49 }
  0x41   :  { %146 = vmatmul.mubr.f32.gmra.mrb[4].mxu0 %v27_v50 }
  0x42   :  { %605 = vmatprep.mubr.msk.f32.mxu0 %vm58_vm0, %v30_v51 }
  0x45   :  { %151 = vmatmul.mubr.f32.gmra.mrb[6].mxu0 %v29_v52 }
  0x46   :  { %726 = vmatprep.mubr.msk.f32.mxu0 %vm828_vm1, %v827_v44 }
 0x10c   :  { %v137_v12 = vpop.f32.mrb[0].mxu0 }
 0x10d   :  { %v139_v13 = vpop.f32.mrb[1].mxu0 }
 0x110   :  { %v142_v14 = vpop.f32.mrb[2].mxu0 }
 0x111   :  { %v156_v15 = vadd.f32 %v142_v14, %v137_v12  ;;  %v144_v16 = vpop.f32.mrb[3].mxu0 }
 0x114   :  { %v147_v17 = vpop.f32.mrb[4].mxu0 }
 0x115   :  { %v157_v19 = vadd.f32 %v156_v15, %v147_v17  ;;  %v149_v20 = vpop.f32.mrb[5].mxu0 }
 0x118   :  { %v152_v21 = vpop.f32.mrb[6].mxu0 }
 0x119   :  { %v158_v22 = vadd.f32 %v157_v19, %v152_v21  ;;  %v154_v23 = vpop.f32.mrb[7].mxu0 }
 0x11b   :  { %v159_v24 = vrot.slane %v158_v22, 4 }
 0x11d   :  { %v160_v25 = vadd.f32 %v159_v24, %v158_v22 }
 0x11f   :  { %v161_v26 = vrot.slane %v160_v25, 2 }
 0x121   :  { %v162_v27 = vadd.f32 %v161_v26, %v160_v25 }
 0x123   :  { %v163_v28 = vrot.slane %v162_v27, 1 }
 0x125   :  { %v164_v29 = vadd.f32 %v163_v28, %v162_v27 }
 0x127   :  { %682 = vmatmul.mubr.f32.vlgmr.msra.gmra.mrb[0].mxu1 %v164_v29 }
 0x128   :  { %685 = vmatpush3.msra.mxu1 %v1061_v11  ;;  %686 = vmatprep.mubr.msk.f32.mxu1 %vm828_vm1, %v827_v44 }
 0x129   :  { %797 = vmatprep.subr.bf16.mxu1 %v826_v0 }
 0x1fa   :  { %v247_v30 = vpop.f32.mrb[0].mxu1 }
 0x1fb   :  { %v251_v31 = vmul.f32 0.001953125, %v247_v30  ;;  %v683_v32 = vpop.f32.mrb[1].mxu1 }
 0x1fd   :  { %687 = vmatmul.mubr.msk.f32.vlgmr.msra.gmra.mrb[2].mxu1 %vm253_vm2, %v251_v31 }
 0x1fe   :  { %799 = vmatpush3.bf16.msra.mxu1 %v909_v18  ;;  %721 = vmatprep.mubr.msk.f32.mxu1 %vm828_vm1, %v827_v44  ;;  %v327_v18 = vlaneseq }
 0x1ff   :  { %800 = vmatprep.subr.bf16.mxu1 %v826_v0 }
 0x200   :  { %v328_v33 = vshrl.u32 %v327_v18, 7 }
 0x202   :  { %802 = vmatpush3.bf16.msra.mxu1 %v1005_v55  ;;  %v329_v34 = vsub.s32 0, %v328_v33  ;;  %v496_v55 = vld [vmem:[%s1109_s3] sm:$0x1] }
 0x203   :  { %803 = vmatprep.subr.bf16.mxu1 %v826_v0 }
 0x206   :  { %805 = vmatpush3.bf16.msra.mxu1 %v1015_v58 }
 0x207   :  { %806 = vmatprep.subr.bf16.mxu1 %v826_v0 }
 0x20a   :  { %808 = vmatpush3.bf16.msra.mxu1 %v783_v61 }
 0x20b   :  { %809 = vmatprep.subr.bf16.mxu1 %v826_v0 }
 0x20e   :  { %811 = vmatpush3.bf16.msra.mxu1 %v786_v1 }
 0x20f   :  { %812 = vmatprep.subr.bf16.mxu1 %v826_v0 }
 0x212   :  { %814 = vmatpush3.bf16.msra.mxu1 %v789_v4 }
 0x213   :  { %815 = vmatprep.subr.bf16.mxu1 %v826_v0 }
 0x216   :  { %817 = vmatpush3.bf16.msra.mxu1 %v792_v7 }
 0x217   :  { %818 = vmatprep.subr.bf16.mxu1 %v826_v0 }
 0x21a   :  { %820 = vmatpush3.bf16.msra.mxu1 %v795_v10 }
 0x21b   :  { %729 = vmatprep.subr.mxu1 %v827_v44 }
 0x2d0   :  { %v323_v35 = vpop.f32.mrb[2].mxu1 }
 0x2d1   :  { %v330_v36 = vrot.slane %v323_v35, %v329_v34  ;;  %v688_v37 = vpop.f32.mrb[3].mxu1 }
 0x2d3   :  { %v331_v38 = vsub.f32 %v137_v12, %v330_v36  ;;  %v332_v39 = vsub.f32 %v142_v14, %v330_v36  ;;  %v333_v40 = vsub.f32 %v147_v17, %v330_v36  ;;  %v334_v41 = vsub.f32 %v152_v21, %v330_v36 }
 0x2d5   :  { %v335_v42 = vmul.f32 %v331_v38, %v331_v38  ;;  %v336_v43 = vmul.f32 %v332_v39, %v332_v39  ;;  %v337_v45 = vmul.f32 %v333_v40, %v333_v40  ;;  %v338_v47 = vmul.f32 %v334_v41, %v334_v41 }
 0x2d7   :  { %v339_v46 = vadd.f32 %v336_v43, %v335_v42 }
 0x2d9   :  { %v340_v48 = vadd.f32 %v339_v46, %v337_v45 }
 0x2db   :  { %v341_v0 = vadd.f32 %v340_v48, %v338_v47 }
 0x2dd   :  { %v342_v49 = vrot.slane %v341_v0, 4 }
 0x2df   :  { %v343_v50 = vadd.f32 %v342_v49, %v341_v0 }
 0x2e1   :  { %v344_v51 = vrot.slane %v343_v50, 2 }
 0x2e3   :  { %v345_v52 = vadd.f32 %v344_v51, %v343_v50 }
 0x2e5   :  { %v346_v53 = vrot.slane %v345_v52, 1 }
 0x2e7   :  { %v347_v54 = vadd.f32 %v346_v53, %v345_v52 }
 0x2e9   :  { %722 = vmatmul.mubr.f32.vlgmr.msra.gmra.mrb[4].mxu1 %v347_v54 }
 0x2ea   :  { %730 = vmatpush3.msra.mxu1 %v1061_v11  ;;  %731 = vmatprep.mubr.msk.f32.mxu1 %vm828_vm1, %v827_v44 }
 0x2ed   :  { %732 = vmatmul.mubr.msk.f32.vlgmr.msra.gmra.mrb[6].mxu1 %vm253_vm2, %v496_v55 }
 0x3bc   :  { %v414_v56 = vpop.f32.mrb[4].mxu1 }
 0x3bd   :  { %v418_v57 = vmul.f32 0.001953125, %v414_v56  ;;  %v723_v58 = vpop.f32.mrb[5].mxu1 }
 0x3bf   :  { %v419_v59 = vadd.f32 1e-05, %v418_v57 }
 0x3c0   :  { %v566_v44 = vpop.f32.mrb[6].mxu1 }
 0x3c1   :  { %824 = vrsqrt.f32 %v419_v59  ;;  %v733_v63 = vpop.f32.mrb[7].mxu1  ;;  %v581_v4 = vrot.slane %v566_v44, %v329_v34 }
 0x3cb   :  { %v825_v61 = vpop.eup %824 }
 0x3cc   :  { %v422_v62 = vmul.f32 %v825_v61, %v421_v60 }
 0x3ce   :  { %727 = vmatmul.mubr.msk.f32.vlgmr.msra.gmra.mrb[8].mxu0 %vm253_vm2, %v422_v62 }
 0x4a1   :  { %v492_v1 = vpop.f32.mrb[8].mxu0 }
 0x4a2   :  { %v573_v2 = vrot.slane %v492_v1, %v329_v34  ;;  %v728_v3 = vpop.f32.mrb[9].mxu0 }
 0x4a4   :  { %v574_v5 = vmul.f32 %v573_v2, %v331_v38  ;;  %v575_v6 = vmul.f32 %v573_v2, %v332_v39  ;;  %v576_v7 = vmul.f32 %v573_v2, %v333_v40  ;;  %v577_v8 = vmul.f32 %v573_v2, %v334_v41 }
 0x4a6   :  { %v582_v9 = vadd.f32 %v581_v4, %v574_v5  ;;  %v583_v10 = vadd.f32 %v581_v4, %v575_v6  ;;  %v584_v11 = vadd.f32 %v581_v4, %v576_v7  ;;  %v585_v12 = vadd.f32 %v581_v4, %v577_v8 }
 0x4a8   :  { %v586_v13 = vmul.f32 0.2, %v582_v9  ;;  %v587_v14 = vmul.f32 0.2, %v583_v10  ;;  %v588_v15 = vmul.f32 0.2, %v584_v11 }
 0x4a9   :  { %v589_v16 = vmul.f32 0.2, %v585_v12 }
 0x4aa   :  { %v590_v17 = vmax.f32 %v582_v9, %v586_v13  ;;  %v591_v19 = vmax.f32 %v583_v10, %v587_v14  ;;  %v592_v20 = vmax.f32 %v584_v11, %v588_v15 }
 0x4ab   :  { %v593_v21 = vmax.f32 %v585_v12, %v589_v16 }
 0x4ac   :  { %594 = vst [vmem:[%s1111_s6] sm:$0xff] %v590_v17  ;;  %595 = vst [vmem:[%s1111_s6 + $0x8] sm:$0xff] %v591_v19 }
 0x4ad   :  { %596 = vst [vmem:[%s1111_s6 + $0x10] sm:$0xff] %v592_v20  ;;  %597 = vst [vmem:[%s1111_s6 + $0x18] sm:$0xff] %v593_v21 }

</bundles_post_ra>
